<compile_context>
chip_gen: v5e
topology: v5e:2x2
jax: 0.10.0
libtpu: 0.0.40
codegen_flags: <defaults>
</compile_context>

<pallas_src>
import jax
import jax.numpy as jnp
from jax import lax
from jax.experimental import pallas as pl
from jax.experimental.pallas import tpu as pltpu


def _make_shake_kernel(H, W, Cin, Cmid):
    """Build the fused kernel for fixed spatial/channel sizes (closed over statically)."""
    HW = H * W
    pow2_w = (W & (W - 1)) == 0
    w_shift = W.bit_length() - 1

    def kernel(x_ref, s1_ref, b1_ref, w1_ref, b2_ref,
               w2_ref, b3_ref, w3_ref, cb3_ref, o_ref):
        # x_ref : (Cin, H*W)        input image, batch squeezed, spatial flattened on lanes
        # w1    : (Cmid, Cin)       1x1 conv weight with BN2 scale folded in
        # w2    : (Cmid, 9*Cmid)    3x3 conv weight (tap-major K) with BN3 scale folded in
        # w3    : (Cin, Cmid)       1x1 conv weight with alpha folded in
        # cb3   : (Cin, 1)          conv3 bias with alpha folded in

        # ---- stage 1: BN1 + ReLU, 1x1 conv (single matmul), + BN2 shift, ReLU ----
        x = x_ref[...]                                                   # (Cin, HW)
        h = jnp.maximum(x * s1_ref[...] + b1_ref[...], 0.0)
        a = jnp.dot(w1_ref[...], h, preferred_element_type=jnp.float32) + b2_ref[...]
        a = jnp.maximum(a, 0.0)                                          # (Cmid, HW)

        # ---- stage 2: 3x3 SAME conv: 9 lane-rolled + masked slabs, one K=9*Cmid matmul ---
        idx = lax.broadcasted_iota(jnp.int32, (Cmid, HW), 1)             # flat pixel index p
        if pow2_w:
            w_idx = idx & (W - 1)
            h_idx = idx >> w_shift
        else:
            w_idx = idx % W
            h_idx = idx // W

        slabs = []
        for ky in range(3):
            for kx in range(3):
                dy, dx = ky - 1, kx - 1
                d = dy * W + dx                                          # flat lane shift
                # shifted[p] = a[(p + d) mod HW]; wrap positions are masked to zero below.
                win = a if d == 0 else pltpu.roll(a, shift=(-d) % HW, axis=1)
                conds = []
                if dy == -1:
                    conds.append(h_idx >= 1)                             # row h-1 exists
                elif dy == 1:
                    conds.append(h_idx <= H - 2)                         # row h+1 exists
                if dx == -1:
                    conds.append(w_idx >= 1)                             # col w-1 exists
                elif dx == 1:
                    conds.append(w_idx <= W - 2)                         # col w+1 exists
                if conds:
                    m = conds[0]
                    for c in conds[1:]:
                        m = jnp.logical_and(m, c)
                    win = jnp.where(m, win, 0.0)
                slabs.append(win)
        stacked = jnp.concatenate(slabs, axis=0)                         # (9*Cmid, HW)

        b = jnp.dot(w2_ref[...], stacked,
                    preferred_element_type=jnp.float32) + b3_ref[...]    # + BN3 shift
        b = jnp.maximum(b, 0.0)                                          # (Cmid, HW)

        # ---- stage 3: 1x1 conv (+bias), alpha pre-folded, shake residual ----
        y = jnp.dot(w3_ref[...], b, preferred_element_type=jnp.float32) + cb3_ref[...]
        o_ref[...] = x + y

    return kernel


def shake_block(x, alpha, params):
    """x: (N, Cin, H, W) float32 NCHW (matching the PyTorch module).  alpha: scalar."""
    N, Cin, H, W = x.shape
    Cmid = params["w1"].shape[0]
    HW = H * W

    # Fold BN2 into conv1's weight, BN3 into conv2's weight, and alpha into conv3.
    # (Exact up to FP reassociation; done once per call on tiny weight tensors.)
    s1f = params["s1"].reshape(Cin, 1)
    b1f = params["b1"].reshape(Cin, 1)
    w1f = params["s2"].reshape(Cmid, 1) * params["w1"]                     # (Cmid, Cin)
    b2f = params["b2"].reshape(Cmid, 1)
    w2s = params["s3"].reshape(Cmid, 1, 1, 1) * params["w2"]               # (Cmid,Cmid,3,3)
    w2f = jnp.transpose(w2s, (0, 2, 3, 1)).reshape(Cmid, 9 * Cmid)         # tap-major K
    b3f = params["b3"].reshape(Cmid, 1)
    w3f = alpha * params["w3"]                                             # (Cin, Cmid)
    cb3f = (alpha * params["cb3"]).reshape(Cin, 1)

    xf = x.reshape(N, Cin, HW)

    def rep(shape):
        # whole (small) array, replicated across grid steps (constant index map)
        nd = len(shape)
        return pl.BlockSpec(shape, lambda n, nd=nd: (0,) * nd)

    act_spec = pl.BlockSpec((None, Cin, HW), lambda n: (n, 0, 0))

    out = pl.pallas_call(
        _make_shake_kernel(H, W, Cin, Cmid),
        out_shape=jax.ShapeDtypeStruct((N, Cin, HW), jnp.float32),
        grid=(N,),
        in_specs=[
            act_spec,
            rep((Cin, 1)), rep((Cin, 1)), rep((Cmid, Cin)), rep((Cmid, 1)),
            rep((Cmid, 9 * Cmid)), rep((Cmid, 1)), rep((Cin, Cmid)), rep((Cin, 1)),
        ],
        out_specs=act_spec,
        compiler_params=pltpu.CompilerParams(dimension_semantics=("parallel",)),
    )(xf, s1f, b1f, w1f, b2f, w2f, b3f, w3f, cb3f)

    return out.reshape(N, Cin, H, W)


def init_params(key, in_channels, f=2):
    """Deterministic synthetic parameters. BN params folded to (scale, shift)."""
    cin = in_channels
    cmid = int(in_channels * f)
    eps = 1e-5
    keys = jax.random.split(key, 16)

    def bn_fold(kg, kb, km, kv, c):
        gamma = 1.0 + 0.1 * jax.random.normal(kg, (c,), jnp.float32)
        beta = 0.1 * jax.random.normal(kb, (c,), jnp.float32)
        mean = 0.1 * jax.random.normal(km, (c,), jnp.float32)
        var = 0.5 + jnp.abs(jax.random.normal(kv, (c,), jnp.float32))
        scale = gamma / jnp.sqrt(var + eps)
        shift = beta - mean * scale
        return scale, shift

    s1, b1 = bn_fold(keys[0], keys[1], keys[2], keys[3], cin)
    s2, b2 = bn_fold(keys[4], keys[5], keys[6], keys[7], cmid)
    s3, b3 = bn_fold(keys[8], keys[9], keys[10], keys[11], cmid)

    w1 = jax.random.normal(keys[12], (cmid, cin), jnp.float32) / jnp.sqrt(cin)
    w2 = jax.random.normal(keys[13], (cmid, cmid, 3, 3), jnp.float32) / jnp.sqrt(9 * cmid)
    w3 = jax.random.normal(keys[14], (cin, cmid), jnp.float32) / jnp.sqrt(cmid)
    cb3 = 0.01 * jax.random.normal(keys[15], (cin,), jnp.float32)

    return dict(s1=s1, b1=b1, w1=w1, s2=s2, b2=b2, w2=w2,
                s3=s3, b3=b3, w3=w3, cb3=cb3)


def ref_shake_block(x, alpha, p):
    """Pure-JAX NCHW reference mirroring the PyTorch forward (eval-mode BN)."""
    dn = ("NCHW", "OIHW", "NCHW")
    cin = x.shape[1]
    cmid = p["w1"].shape[0]
    hp = lax.Precision.HIGHEST

    def bn_act(h, s, b):
        return jnp.maximum(h * s.reshape(1, -1, 1, 1) + b.reshape(1, -1, 1, 1), 0.0)

    h = bn_act(x, p["s1"], p["b1"])
    h = lax.conv_general_dilated(h, p["w1"].reshape(cmid, cin, 1, 1), (1, 1), "VALID",
                                 dimension_numbers=dn, precision=hp)
    h = bn_act(h, p["s2"], p["b2"])
    h = lax.conv_general_dilated(h, p["w2"], (1, 1), "SAME",
                                 dimension_numbers=dn, precision=hp)
    h = bn_act(h, p["s3"], p["b3"])
    h = lax.conv_general_dilated(h, p["w3"].reshape(cin, cmid, 1, 1), (1, 1), "VALID",
                                 dimension_numbers=dn, precision=hp)
    h = h + p["cb3"].reshape(1, cin, 1, 1)
    return x + alpha * h


if __name__ == "__main__":
    N, C, H, W = 2, 4, 16, 16   # in_channels=4, f=2 -> mid_channels=8
    alpha = 0.37

    key = jax.random.PRNGKey(0)
    kx, kp = jax.random.split(key)
    x = jax.random.normal(kx, (N, C, H, W), jnp.float32)   # NCHW, like PyTorch
    params = init_params(kp, C, f=2)

    out = shake_block(x, alpha, params)
    out = jax.block_until_ready(out)

    ref = jax.block_until_ready(ref_shake_block(x, alpha, params))
    assert out.shape == (N, C, H, W)
    assert jnp.allclose(out, ref, rtol=1e-4, atol=1e-4), \
        f"max abs err = {jnp.max(jnp.abs(out - ref))}"

    print("KERNEL_OK")
</pallas_src>

<mosaic_0001>
module attributes {stable_mosaic.version = 11 : i64} {
  func.func @kernel(%arg0: i32, %arg1: memref<1x4x256xf32, #tpu.memory_space<vmem>>, %arg2: memref<4x1xf32, #tpu.memory_space<vmem>>, %arg3: memref<4x1xf32, #tpu.memory_space<vmem>>, %arg4: memref<8x4xf32, #tpu.memory_space<vmem>>, %arg5: memref<8x1xf32, #tpu.memory_space<vmem>>, %arg6: memref<8x72xf32, #tpu.memory_space<vmem>>, %arg7: memref<8x1xf32, #tpu.memory_space<vmem>>, %arg8: memref<4x8xf32, #tpu.memory_space<vmem>>, %arg9: memref<4x1xf32, #tpu.memory_space<vmem>>, %arg10: memref<1x4x256xf32, #tpu.memory_space<vmem>>) attributes {dimension_semantics = [#tpu.dimension_semantics<parallel>], iteration_bounds = array<i64: 2>, scalar_prefetch = 0 : i64, scratch_operands = 0 : i64, tpu.core_type = #tpu.core_type<tc>, window_params = [{transform_indices = @transform_0, window_bounds = array<i64: 1, 4, 256>}, {pipeline_mode = #tpu.pipeline_mode<synchronous>, transform_indices = @transform_1, window_bounds = array<i64: 4, 1>}, {pipeline_mode = #tpu.pipeline_mode<synchronous>, transform_indices = @transform_2, window_bounds = array<i64: 4, 1>}, {pipeline_mode = #tpu.pipeline_mode<synchronous>, transform_indices = @transform_3, window_bounds = array<i64: 8, 4>}, {pipeline_mode = #tpu.pipeline_mode<synchronous>, transform_indices = @transform_4, window_bounds = array<i64: 8, 1>}, {pipeline_mode = #tpu.pipeline_mode<synchronous>, transform_indices = @transform_5, window_bounds = array<i64: 8, 72>}, {pipeline_mode = #tpu.pipeline_mode<synchronous>, transform_indices = @transform_6, window_bounds = array<i64: 8, 1>}, {pipeline_mode = #tpu.pipeline_mode<synchronous>, transform_indices = @transform_7, window_bounds = array<i64: 4, 8>}, {pipeline_mode = #tpu.pipeline_mode<synchronous>, transform_indices = @transform_8, window_bounds = array<i64: 4, 1>}, {transform_indices = @transform_9, window_bounds = array<i64: 1, 4, 256>}]} {
    %c0 = arith.constant 0 : index
    %c0_0 = arith.constant 0 : index
    %c0_1 = arith.constant 0 : index
    %0 = vector.load %arg1[%c0, %c0_0, %c0_1] : memref<1x4x256xf32, #tpu.memory_space<vmem>>, vector<1x4x256xf32>
    %1 = vector.shape_cast %0 : vector<1x4x256xf32> to vector<4x256xf32>
    %c0_2 = arith.constant 0 : index
    %c0_3 = arith.constant 0 : index
    %2 = vector.load %arg2[%c0_2, %c0_3] : memref<4x1xf32, #tpu.memory_space<vmem>>, vector<4x1xf32>
    %3 = vector.broadcast %2 : vector<4x1xf32> to vector<4x256xf32>
    %4 = arith.mulf %1, %3 : vector<4x256xf32>
    %c0_4 = arith.constant 0 : index
    %c0_5 = arith.constant 0 : index
    %5 = vector.load %arg3[%c0_4, %c0_5] : memref<4x1xf32, #tpu.memory_space<vmem>>, vector<4x1xf32>
    %6 = vector.broadcast %5 : vector<4x1xf32> to vector<4x256xf32>
    %7 = arith.addf %4, %6 : vector<4x256xf32>
    %cst = arith.constant 0.000000e+00 : f32
    %8 = vector.broadcast %cst : f32 to vector<4x256xf32>
    %9 = arith.maximumf %7, %8 : vector<4x256xf32>
    %c0_6 = arith.constant 0 : index
    %c0_7 = arith.constant 0 : index
    %10 = vector.load %arg4[%c0_6, %c0_7] : memref<8x4xf32, #tpu.memory_space<vmem>>, vector<8x4xf32>
    %cst_8 = arith.constant dense<0.000000e+00> : vector<8x256xf32>
    %11 = tpu.matmul %10, %9, %cst_8 {dimension_numbers = #tpu.dot_dimension_numbers<[1], [0], [0], [1], [0, 0, 1, 1], [], []>} : vector<8x4xf32>, vector<4x256xf32>, vector<8x256xf32> -> vector<8x256xf32>
    %c0_9 = arith.constant 0 : index
    %c0_10 = arith.constant 0 : index
    %12 = vector.load %arg5[%c0_9, %c0_10] : memref<8x1xf32, #tpu.memory_space<vmem>>, vector<8x1xf32>
    %13 = vector.broadcast %12 : vector<8x1xf32> to vector<8x256xf32>
    %14 = arith.addf %11, %13 : vector<8x256xf32>
    %cst_11 = arith.constant 0.000000e+00 : f32
    %15 = vector.broadcast %cst_11 : f32 to vector<8x256xf32>
    %16 = arith.maximumf %14, %15 : vector<8x256xf32>
    %17 = tpu.iota {dimensions = array<i32: 1>} : vector<8x256xi32>
    %c15_i32 = arith.constant 15 : i32
    %18 = vector.broadcast %c15_i32 : i32 to vector<8x256xi32>
    %19 = arith.andi %17, %18 : vector<8x256xi32>
    %c4_i32 = arith.constant 4 : i32
    %20 = vector.broadcast %c4_i32 : i32 to vector<8x256xi32>
    %21 = arith.shrsi %17, %20 : vector<8x256xi32>
    %c17_i32 = arith.constant 17 : i32
    %22 = tpu.dynamic_rotate %16 by %c17_i32 dim 1 : vector<8x256xf32>, i32 -> vector<8x256xf32>
    %c1_i32 = arith.constant 1 : i32
    %23 = vector.broadcast %c1_i32 : i32 to vector<8x256xi32>
    %24 = arith.cmpi sge, %21, %23 : vector<8x256xi32>
    %c1_i32_12 = arith.constant 1 : i32
    %25 = vector.broadcast %c1_i32_12 : i32 to vector<8x256xi32>
    %26 = arith.cmpi sge, %19, %25 : vector<8x256xi32>
    %27 = arith.andi %24, %26 : vector<8x256xi1>
    %cst_13 = arith.constant 0.000000e+00 : f32
    %28 = vector.broadcast %cst_13 : f32 to vector<8x256xf32>
    %29 = arith.select %27, %22, %28 : vector<8x256xi1>, vector<8x256xf32>
    %c16_i32 = arith.constant 16 : i32
    %30 = tpu.dynamic_rotate %16 by %c16_i32 dim 1 : vector<8x256xf32>, i32 -> vector<8x256xf32>
    %c1_i32_14 = arith.constant 1 : i32
    %31 = vector.broadcast %c1_i32_14 : i32 to vector<8x256xi32>
    %32 = arith.cmpi sge, %21, %31 : vector<8x256xi32>
    %cst_15 = arith.constant 0.000000e+00 : f32
    %33 = vector.broadcast %cst_15 : f32 to vector<8x256xf32>
    %34 = arith.select %32, %30, %33 : vector<8x256xi1>, vector<8x256xf32>
    %c15_i32_16 = arith.constant 15 : i32
    %35 = tpu.dynamic_rotate %16 by %c15_i32_16 dim 1 : vector<8x256xf32>, i32 -> vector<8x256xf32>
    %c1_i32_17 = arith.constant 1 : i32
    %36 = vector.broadcast %c1_i32_17 : i32 to vector<8x256xi32>
    %37 = arith.cmpi sge, %21, %36 : vector<8x256xi32>
    %c14_i32 = arith.constant 14 : i32
    %38 = vector.broadcast %c14_i32 : i32 to vector<8x256xi32>
    %39 = arith.cmpi sle, %19, %38 : vector<8x256xi32>
    %40 = arith.andi %37, %39 : vector<8x256xi1>
    %cst_18 = arith.constant 0.000000e+00 : f32
    %41 = vector.broadcast %cst_18 : f32 to vector<8x256xf32>
    %42 = arith.select %40, %35, %41 : vector<8x256xi1>, vector<8x256xf32>
    %c1_i32_19 = arith.constant 1 : i32
    %43 = tpu.dynamic_rotate %16 by %c1_i32_19 dim 1 : vector<8x256xf32>, i32 -> vector<8x256xf32>
    %c1_i32_20 = arith.constant 1 : i32
    %44 = vector.broadcast %c1_i32_20 : i32 to vector<8x256xi32>
    %45 = arith.cmpi sge, %19, %44 : vector<8x256xi32>
    %cst_21 = arith.constant 0.000000e+00 : f32
    %46 = vector.broadcast %cst_21 : f32 to vector<8x256xf32>
    %47 = arith.select %45, %43, %46 : vector<8x256xi1>, vector<8x256xf32>
    %c255_i32 = arith.constant 255 : i32
    %48 = tpu.dynamic_rotate %16 by %c255_i32 dim 1 : vector<8x256xf32>, i32 -> vector<8x256xf32>
    %c14_i32_22 = arith.constant 14 : i32
    %49 = vector.broadcast %c14_i32_22 : i32 to vector<8x256xi32>
    %50 = arith.cmpi sle, %19, %49 : vector<8x256xi32>
    %cst_23 = arith.constant 0.000000e+00 : f32
    %51 = vector.broadcast %cst_23 : f32 to vector<8x256xf32>
    %52 = arith.select %50, %48, %51 : vector<8x256xi1>, vector<8x256xf32>
    %c241_i32 = arith.constant 241 : i32
    %53 = tpu.dynamic_rotate %16 by %c241_i32 dim 1 : vector<8x256xf32>, i32 -> vector<8x256xf32>
    %c14_i32_24 = arith.constant 14 : i32
    %54 = vector.broadcast %c14_i32_24 : i32 to vector<8x256xi32>
    %55 = arith.cmpi sle, %21, %54 : vector<8x256xi32>
    %c1_i32_25 = arith.constant 1 : i32
    %56 = vector.broadcast %c1_i32_25 : i32 to vector<8x256xi32>
    %57 = arith.cmpi sge, %19, %56 : vector<8x256xi32>
    %58 = arith.andi %55, %57 : vector<8x256xi1>
    %cst_26 = arith.constant 0.000000e+00 : f32
    %59 = vector.broadcast %cst_26 : f32 to vector<8x256xf32>
    %60 = arith.select %58, %53, %59 : vector<8x256xi1>, vector<8x256xf32>
    %c240_i32 = arith.constant 240 : i32
    %61 = tpu.dynamic_rotate %16 by %c240_i32 dim 1 : vector<8x256xf32>, i32 -> vector<8x256xf32>
    %c14_i32_27 = arith.constant 14 : i32
    %62 = vector.broadcast %c14_i32_27 : i32 to vector<8x256xi32>
    %63 = arith.cmpi sle, %21, %62 : vector<8x256xi32>
    %cst_28 = arith.constant 0.000000e+00 : f32
    %64 = vector.broadcast %cst_28 : f32 to vector<8x256xf32>
    %65 = arith.select %63, %61, %64 : vector<8x256xi1>, vector<8x256xf32>
    %c239_i32 = arith.constant 239 : i32
    %66 = tpu.dynamic_rotate %16 by %c239_i32 dim 1 : vector<8x256xf32>, i32 -> vector<8x256xf32>
    %c14_i32_29 = arith.constant 14 : i32
    %67 = vector.broadcast %c14_i32_29 : i32 to vector<8x256xi32>
    %68 = arith.cmpi sle, %21, %67 : vector<8x256xi32>
    %c14_i32_30 = arith.constant 14 : i32
    %69 = vector.broadcast %c14_i32_30 : i32 to vector<8x256xi32>
    %70 = arith.cmpi sle, %19, %69 : vector<8x256xi32>
    %71 = arith.andi %68, %70 : vector<8x256xi1>
    %cst_31 = arith.constant 0.000000e+00 : f32
    %72 = vector.broadcast %cst_31 : f32 to vector<8x256xf32>
    %73 = arith.select %71, %66, %72 : vector<8x256xi1>, vector<8x256xf32>
    %74 = tpu.concatenate %29, %34, %42, %47, %16, %52, %60, %65, %73 in 0 : vector<8x256xf32>, vector<8x256xf32>, vector<8x256xf32>, vector<8x256xf32>, vector<8x256xf32>, vector<8x256xf32>, vector<8x256xf32>, vector<8x256xf32>, vector<8x256xf32> -> vector<72x256xf32>
    %c0_32 = arith.constant 0 : index
    %c0_33 = arith.constant 0 : index
    %75 = vector.load %arg6[%c0_32, %c0_33] : memref<8x72xf32, #tpu.memory_space<vmem>>, vector<8x72xf32>
    %cst_34 = arith.constant dense<0.000000e+00> : vector<8x256xf32>
    %76 = tpu.matmul %75, %74, %cst_34 {dimension_numbers = #tpu.dot_dimension_numbers<[1], [0], [0], [1], [0, 0, 1, 1], [], []>} : vector<8x72xf32>, vector<72x256xf32>, vector<8x256xf32> -> vector<8x256xf32>
    %c0_35 = arith.constant 0 : index
    %c0_36 = arith.constant 0 : index
    %77 = vector.load %arg7[%c0_35, %c0_36] : memref<8x1xf32, #tpu.memory_space<vmem>>, vector<8x1xf32>
    %78 = vector.broadcast %77 : vector<8x1xf32> to vector<8x256xf32>
    %79 = arith.addf %76, %78 : vector<8x256xf32>
    %cst_37 = arith.constant 0.000000e+00 : f32
    %80 = vector.broadcast %cst_37 : f32 to vector<8x256xf32>
    %81 = arith.maximumf %79, %80 : vector<8x256xf32>
    %c0_38 = arith.constant 0 : index
    %c0_39 = arith.constant 0 : index
    %82 = vector.load %arg8[%c0_38, %c0_39] : memref<4x8xf32, #tpu.memory_space<vmem>>, vector<4x8xf32>
    %cst_40 = arith.constant dense<0.000000e+00> : vector<4x256xf32>
    %83 = tpu.matmul %82, %81, %cst_40 {dimension_numbers = #tpu.dot_dimension_numbers<[1], [0], [0], [1], [0, 0, 1, 1], [], []>} : vector<4x8xf32>, vector<8x256xf32>, vector<4x256xf32> -> vector<4x256xf32>
    %c0_41 = arith.constant 0 : index
    %c0_42 = arith.constant 0 : index
    %84 = vector.load %arg9[%c0_41, %c0_42] : memref<4x1xf32, #tpu.memory_space<vmem>>, vector<4x1xf32>
    %85 = vector.broadcast %84 : vector<4x1xf32> to vector<4x256xf32>
    %86 = arith.addf %83, %85 : vector<4x256xf32>
    %87 = arith.addf %1, %86 : vector<4x256xf32>
    %c0_43 = arith.constant 0 : index
    %c0_44 = arith.constant 0 : index
    %c0_45 = arith.constant 0 : index
    %88 = vector.load %arg10[%c0_43, %c0_44, %c0_45] : memref<1x4x256xf32, #tpu.memory_space<vmem>>, vector<1x4x256xf32>
    %89 = vector.shape_cast %88 : vector<1x4x256xf32> to vector<4x256xf32>
    %90 = vector.shape_cast %87 : vector<4x256xf32> to vector<1x4x256xf32>
    tpu.vector_store %arg10[%c0_43, %c0_44, %c0_45], %90 {strides = array<i32>} : memref<1x4x256xf32, #tpu.memory_space<vmem>>, vector<1x4x256xf32>,
    return
  }
  func.func @transform_0(%arg0: i32) -> (i32, i32, i32) {
    %c0_i32 = arith.constant 0 : i32
    %c0_i32_0 = arith.constant 0 : i32
    %c0_i32_1 = arith.constant 0 : i32
    return %arg0, %c0_i32, %c0_i32_0 : i32, i32, i32
  }
  func.func @transform_1(%arg0: i32) -> (i32, i32) {
    %c0_i32 = arith.constant 0 : i32
    %c0_i32_0 = arith.constant 0 : i32
    %c0_i32_1 = arith.constant 0 : i32
    return %c0_i32, %c0_i32_0 : i32, i32
  }
  func.func @transform_2(%arg0: i32) -> (i32, i32) {
    %c0_i32 = arith.constant 0 : i32
    %c0_i32_0 = arith.constant 0 : i32
    %c0_i32_1 = arith.constant 0 : i32
    return %c0_i32, %c0_i32_0 : i32, i32
  }
  func.func @transform_3(%arg0: i32) -> (i32, i32) {
    %c0_i32 = arith.constant 0 : i32
    %c0_i32_0 = arith.constant 0 : i32
    %c0_i32_1 = arith.constant 0 : i32
    return %c0_i32, %c0_i32_0 : i32, i32
  }
  func.func @transform_4(%arg0: i32) -> (i32, i32) {
    %c0_i32 = arith.constant 0 : i32
    %c0_i32_0 = arith.constant 0 : i32
    %c0_i32_1 = arith.constant 0 : i32
    return %c0_i32, %c0_i32_0 : i32, i32
  }
  func.func @transform_5(%arg0: i32) -> (i32, i32) {
    %c0_i32 = arith.constant 0 : i32
    %c0_i32_0 = arith.constant 0 : i32
    %c0_i32_1 = arith.constant 0 : i32
    return %c0_i32, %c0_i32_0 : i32, i32
  }
  func.func @transform_6(%arg0: i32) -> (i32, i32) {
    %c0_i32 = arith.constant 0 : i32
    %c0_i32_0 = arith.constant 0 : i32
    %c0_i32_1 = arith.constant 0 : i32
    return %c0_i32, %c0_i32_0 : i32, i32
  }
  func.func @transform_7(%arg0: i32) -> (i32, i32) {
    %c0_i32 = arith.constant 0 : i32
    %c0_i32_0 = arith.constant 0 : i32
    %c0_i32_1 = arith.constant 0 : i32
    return %c0_i32, %c0_i32_0 : i32, i32
  }
  func.func @transform_8(%arg0: i32) -> (i32, i32) {
    %c0_i32 = arith.constant 0 : i32
    %c0_i32_0 = arith.constant 0 : i32
    %c0_i32_1 = arith.constant 0 : i32
    return %c0_i32, %c0_i32_0 : i32, i32
  }
  func.func @transform_9(%arg0: i32) -> (i32, i32, i32) {
    %c0_i32 = arith.constant 0 : i32
    %c0_i32_0 = arith.constant 0 : i32
    %c0_i32_1 = arith.constant 0 : i32
    return %arg0, %c0_i32, %c0_i32_0 : i32, i32, i32
  }
}

</mosaic_0001>

<bundles_post_ra>
// kernel: tpu_custom_call.1
= control target key start
LH: loop header
LB: loop body
LE: loop exit
PB: predicated region body
PF: predicated region fallthrough
CT: control target
= control target key end

     0   :  { %14 = vsyncpa [#allocation3], 0  ;;  %s1144_s0 = inlined_call_operand.vmem [shape: f32[2,4,256], index: 0, kind: input, shape index: {}]   ;;  %s1145_s1 = inlined_call_operand.vmem [shape: f32[4,1], index: 1, kind: input, shape index: {}]   ;;  %s1146_s2 = inlined_call_operand.vmem [shape: f32[4,1], index: 2, kind: input, shape index: {}]   ;;  %s1147_s3 = inlined_call_operand.vmem [shape: f32[8,4], index: 3, kind: input, shape index: {}]   ;;  %s1148_s4 = inlined_call_operand.vmem [shape: f32[8,1], index: 4, kind: input, shape index: {}]   ;;  %s1149_s5 = inlined_call_operand.vmem [shape: f32[8,72], index: 5, kind: input, shape index: {}]   ;;  %s1150_s6 = inlined_call_operand.vmem [shape: f32[8,1], index: 6, kind: input, shape index: {}]   ;;  %s1151_s7 = inlined_call_operand.vmem [shape: f32[4,8], index: 7, kind: input, shape index: {}]   ;;  %s1152_s8 = inlined_call_operand.vmem [shape: f32[4,1], index: 8, kind: input, shape index: {}]   ;;  %s1153_s9 = inlined_call_operand.hbm [shape: f32[2,4,256], index: 9, kind: output, shape index: {}]  }
   0x1   :  { %16 = vsyncpa [#allocation3 + $0x1], 0  ;;  %s913_s30 = smov 0   ;;  %s915_s10 = smov 0  }
   0x2   :  { %s917_s11 = smov 0   ;;  %s919_s12 = smov 0  }
   0x3 LB: > { %s934_s13 = sadd.s32 4294967295, %s851_s12   ;;  %s699_s14 = sadd.s32 4294967294, %s851_s12   ;;  %s851_s12 = sphi %s919_s12, %s1175_s12   ;;  %s847_s11 = sphi %s917_s11, %s1174_s11   ;;  %s843_s10 = sphi %s915_s10, %s1173_s10   ;;  %s839_s30 = sphi %s913_s30, %s1172_s30  }
   0x4   : > { %s938_s15 = sadd.s32 1, %s851_s12   ;;  %s223_s16 = sadd.s32 1, %s847_s11 }
   0x5   : > { %s220_s17 = ssub.s32 %s851_s12, %s938_s15  ;;  %p233_p0 = scmp.ne.s32.totalorder %s847_s11, %s843_s10 }
   0x6   : > { %p221_p1 = scmp.eq.s32.totalorder %s220_s17, 0  ;;  %p234_p2 = scmp.eq.s32.totalorder %s934_s13, 1 }
   0x7   : > { %p239_p3 = scmp.ne.s32.totalorder %s843_s10, %s839_s30  ;;  %p240_p4 = scmp.eq.s32.totalorder %s699_s14, 1 }
   0x8   : > { %s949_s18 = scalar_select %p221_p1, %s847_s11, %s223_s16  }
   0x9   : > { %p951_p5 = por %p234_p2, %p233_p0  ;;  %p955_p6 = por %p240_p4, %p239_p3 }
   0xa   : > { %p702_p7 = scmp.ge.s32.totalorder %s851_s12, 1  ;;  %p290_p8 = scmp.lt.s32.totalorder %s851_s12, 3 }
   0xc   : > { %p291_p9 = pnand %p702_p7, %p290_p8 }
   0xd   : > { %p326_p10 = scmp.lt.s32.totalorder (!%p291_p9), %s934_s13, 1  ;;  %s855_s22 = smov (!%p291_p9), 112  }
   0xe   : > { %294 = sbr.rel (%p291_p9) target bundleno = 714 (0x2ca), region = 56  ;;  %s856_s23 = smov (!%p291_p9), 111  }
   0xf   : > { %s857_s24 = smov (!%p291_p9), 127   ;;  %s858_s25 = smov (!%p291_p9), 113  }
  0x10   : > { %s859_s26 = smov (!%p291_p9), 1   ;;  %s862_s29 = smov (!%p291_p9), 17  }
  0x13   : > { %v332_v0 = vld [vmem:[%s1145_s1] sm:$0xf]  ;;  %v853_v1 = vmov 0   ;;  %s327_s27 = scalar_select %p326_p10, %s934_s13, 1  ;;  %v854_v4 = vmov 839922192   ;;  %v417_v26 = vlaneseq }
  0x14   : > { %786 = vset.pattern.permute.xlu0 %v853_v1  ;;  %787 = vset.pattern.permute.xlu1 %v853_v1  ;;  %v343_v2 = vld [vmem:[%s1146_s2] sm:$0xf]  ;;  %v338_v5 = vunpack.c.l.s4 %v854_v4  ;;  %vm370_vm0 = vcmask 1043456   ;;  %vm366_vm1 = vcmask 31744  }
  0x15   : > { %335 = vperm.xlu0 %786, %v332_v0   ;;  %788 = vset.pattern.permute.xlu2 %v853_v1  ;;  %v356_v3 = vld [vmem:[%s1148_s4] sm:$0xff]  ;;  %s735_s28 = sshll.u32 %s327_s27, 3  ;;  %s860_s27 = smov 16   ;;  %v1006_v28 = vand.u32 127, %v417_v26 }
  0x16   : > { %359 = vperm.xlu1 %787, %v356_v3   ;;  %v339_v7 = vunpack.c.0.s8 %v338_v5  ;;  %s330_s16 = scalar_lea.vmem %s1144_s0, %s735_s28  ;;  %v355_v15 = vld [vmem:[%s1147_s3] sm:$0xff]  ;;  %s861_s28 = smov 15  }
  0x17   : > { %v975_v9 = vld [vmem:[%s330_s16] sm:$0xff]  ;;  %v419_v29 = vadd.s32 128, %v1006_v28  ;;  %v420_v30 = vand.u32 15, %v1006_v28  ;;  %v422_v31 = vshra.s32 %v1006_v28, 4  ;;  %vm505_vm6 = vcmp.lt.s32.totalorder %v1006_v28, 111 }
  0x18   : > { %v513_v25 = vld [vmem:[%s1150_s6] sm:$0xff]  ;;  %vm496_vm9 = vcmp.lt.s32.totalorder %v1006_v28, 112  ;;  %vm483_vm12 = vcmp.lt.s32.totalorder %v1006_v28, 113  ;;  %vm474_vm15 = vcmp.lt.s32.totalorder %v1006_v28, 127 }
  0x19   : > { %v421_v32 = vand.u32 15, %v419_v29  ;;  %v423_v33 = vshra.s32 %v419_v29, 4  ;;  %vm1011_vm2 = vcmp.le.s32.totalorder %v420_v30, 14  ;;  %vm1015_vm3 = vcmp.le.s32.totalorder %v422_v31, 14 }
  0x1a   : > { %vm508_vm7 = vmand %vm1015_vm3, %vm1011_vm2  ;;  %vm1037_vm10 = vcmp.ge.s32.totalorder %v420_v30, 1 }
  0x1b   : > { %vm1019_vm4 = vcmp.le.s32.totalorder %v421_v32, 14  ;;  %vm1023_vm5 = vcmp.le.s32.totalorder %v423_v33, 14  ;;  %vm1045_vm11 = vcmp.ge.s32.totalorder %v421_v32, 1  ;;  %vm488_vm13 = vmand %vm1015_vm3, %vm1037_vm10 }
  0x1c   : > { %vm509_vm8 = vmand %vm1023_vm5, %vm1019_vm4 }
  0x1d   : > { %346 = vperm.xlu0 %786, %v343_v2   ;;  %vm489_vm14 = vmand %vm1023_vm5, %vm1045_vm11 }
  0x87   : > { %v336_v6 = vpop.permute.xlu0 %335 }
  0x88   : > { %v340_v8 = vperm.slane %v336_v6, %v339_v7  ;;  %v360_v18 = vpop.permute.xlu1 %359 }
  0x8a   : > { %v342_v11 = vmul.f32 %v340_v8, %v975_v9 }
  0x8f   : > { %v347_v10 = vpop.permute.xlu0 %346 }
  0x90   : > { %v351_v12 = vperm.slane %v347_v10, %v339_v7  ;;  %v512_v7 = vld [vmem:[%s1149_s5] sm:$0xff] }
  0x92   : > { %v353_v13 = vadd.f32 %v351_v12, %v342_v11  ;;  %v566_v11 = vld [vmem:[%s1152_s8] sm:$0xf] }
  0x94   : > { %v354_v14 = vmax.f32 %v353_v13, 0.0 }
  0x96   : > { %363 = vst [vmem:[#allocation1] ss:$2 sm:$0xff] %v354_v14 }
  0x9d   : > { %v364_v16 = vld.sshfl [vmem:[#allocation1] sm:$0xff pattern:$0x75316420]  ;;  %v365_v17 = vld.sshfl [vmem:[#allocation1 + $0x8] sm:$0xff pattern:$0x75316420] }
  0x9e   : > { %706 = vmatpush.msk.msra.mxu0 %vm370_vm0, %v364_v16  ;;  %708 = vmatpush.msk.msra.mxu1 %vm370_vm0, %v365_v17 }
  0x9f   : > { %707 = vmatmul.msk.f32.vlgmr.msra.gmra.mxu0 %vm366_vm1, %v355_v15  ;;  %709 = vmatmul.msk.f32.vlgmr.msra.gmra.mxu1 %vm366_vm1, %v355_v15  ;;  %vm465_vm1 = vcmp.lt.s32.totalorder %v1006_v28, 1 }
 0x11c   : > { %v392_v19 = vpop.f32.mrf.mxu0  ;;  %v412_v20 = vpop.f32.mrf.mxu1 }
 0x11d   : > { %v393_v21 = vadd.f32 %v392_v19, %v360_v18  ;;  %v413_v22 = vadd.f32 %v412_v20, %v360_v18  ;;  %v565_v19 = vld [vmem:[%s1151_s7] sm:$0xf] }
 0x11f   : > { %v983_v23 = vmax.f32 %v393_v21, 0.0  ;;  %v985_v24 = vmax.f32 %v413_v22, 0.0 }
 0x121   : > { %494 = vrot.lane.b32.xlu0 %v985_v24, %s855_s22  ;;  %503 = vrot.lane.b32.xlu2 %v985_v24, %s856_s23 }
 0x122   : > { %501 = vrot.lane.b32.xlu1 %v983_v23, %s856_s23 }
 0x129   : > { %470 = vrot.lane.b32.xlu0 %v983_v23, %s857_s24  ;;  %492 = vrot.lane.b32.xlu2 %v983_v23, %s855_s22 }
 0x12a   : > { %479 = vrot.lane.b32.xlu1 %v983_v23, %s858_s25 }
 0x131   : > { %463 = vrot.lane.b32.xlu0 %v985_v24, %s859_s26  ;;  %481 = vrot.lane.b32.xlu2 %v985_v24, %s858_s25 }
 0x132   : > { %472 = vrot.lane.b32.xlu1 %v985_v24, %s857_s24 }
 0x139   : > { %439 = vrot.lane.b32.xlu0 %v983_v23, %s860_s27  ;;  %461 = vrot.lane.b32.xlu2 %v983_v23, %s859_s26  ;;  %s323_s26 = sand.u32 1, %s843_s10  }
 0x13a   : > { %448 = vrot.lane.b32.xlu1 %v983_v23, %s861_s28 }
 0x141   : > { %426 = vrot.lane.b32.xlu0 %v985_v24, %s862_s29  ;;  %450 = vrot.lane.b32.xlu2 %v985_v24, %s861_s28  ;;  %s736_s28 = sshll.u32 %s934_s13, 3  ;;  %s624_s13 = scalar_lea.sflag [#allocation3], %s323_s26 }
 0x142   : > { %441 = vrot.lane.b32.xlu1 %v985_v24, %s860_s27  ;;  %s703_s27 = sshll.u32 %s323_s26, 3  ;;  %s635_s16 = scalar_lea.hbm %s1153_s9, %s736_s28 }
 0x143   : > { %s325_s17 = scalar_lea.vmem [#allocation2], %s703_s27  ;;  %s639_s22 = sshll.u32 %s635_s16, 4  ;;  %s640_s22 = int_to_ptr.hbm [resolvable:$true] %s639_s22 }
 0x144   : > { %s637_s21 = sshll.u32 %s325_s17, 4  ;;  %s803_s23 = sshra.s32 %s640_s22, 4  ;;  %s638_s21 = int_to_ptr.vmem [resolvable:$true] %s637_s21  ;;  %s804_s23 = int_to_ptr.hbm [resolvable:$true] %s803_s23 }
 0x145   : > { %s805_s24 = scalar_lea.hbm %s804_s23, 8  ;;  %s809_s27 = scalar_lea.hbm %s1153_s9, 16 }
 0x146   : > { %p806_p11 = scmp.ne.s32.totalorder %s804_s23, %s805_s24  ;;  %p810_p0 = scmp.lt.s32.totalorder %s804_s23, %s1153_s9 }
 0x147   : > { %p811_p1 = scmp.lt.s32.totalorder %s809_s27, %s805_s24 }
 0x148   : > { %p807_p12 = pnand %p806_p11, %p951_p5 }
 0x149   : > { %424 = vrot.lane.b32.xlu2 %v983_v23, %s862_s29  ;;  %p812_p2 = por %p811_p1, %p810_p0 }
 0x14a   : > { %516 = vperm.xlu1 %787, %v513_v25   ;;  %p808_p13 = pneg %p807_p12 }
 0x14c   : > { %p813_p3 = pnand %p812_p2, %p808_p13 }
 0x151   : > { %569 = vperm.xlu2 %788, %v566_v11  }
 0x17b   : > { %v504_v27 = vpop.permute.xlu2 %503 }
 0x183   : > { %v493_v34 = vpop.permute.xlu2 %492 }
 0x18b   : > { %v482_v46 = vpop.permute.xlu2 %481 }
 0x193   : > { %v495_v39 = vpop.permute.xlu0 %494  ;;  %v462_v52 = vpop.permute.xlu2 %461 }
 0x194   : > { %v502_v40 = vpop.permute.xlu1 %501  ;;  %v497_v43 = vsel %vm496_vm9, %v493_v34, %v495_v39  ;;  %v498_v44 = vsel %vm496_vm9, %v495_v39, %v493_v34  ;;  %vm443_vm9 = vcmp.lt.s32.totalorder %v1006_v28, 16 }
 0x195   : > { %v506_v41 = vsel %vm505_vm6, %v502_v40, %v504_v27  ;;  %v507_v42 = vsel %vm505_vm6, %v504_v27, %v502_v40  ;;  %vm452_vm6 = vcmp.lt.s32.totalorder %v1006_v28, 15 }
 0x196   : > { %710 = vmatpush.msk.msra.mxu2 %vm508_vm7, %v506_v41  ;;  %719 = vmatpush.msk.msra.mxu3 %vm509_vm8, %v507_v42 }
 0x198   : > { %711 = vmatpush.msk.msra.mxu2 %vm1015_vm3, %v497_v43  ;;  %720 = vmatpush.msk.msra.mxu3 %vm1023_vm5, %v498_v44  ;;  %vm1064_vm3 = vcmp.ge.s32.totalorder %v422_v31, 1  ;;  %vm1070_vm5 = vcmp.ge.s32.totalorder %v423_v33, 1 }
 0x199   : > { %vm457_vm7 = vmand %vm1064_vm3, %vm1011_vm2 }
 0x19a   : > { %vm458_vm8 = vmand %vm1070_vm5, %vm1019_vm4 }
 0x19b   : > { %v471_v48 = vpop.permute.xlu0 %470  ;;  %v451_v62 = vpop.permute.xlu2 %450 }
 0x19c   : > { %v480_v49 = vpop.permute.xlu1 %479 }
 0x19d   : > { %v484_v50 = vsel %vm483_vm12, %v480_v49, %v482_v46  ;;  %v485_v51 = vsel %vm483_vm12, %v482_v46, %v480_v49  ;;  %vm428_vm12 = vcmp.lt.s32.totalorder %v1006_v28, 17 }
 0x19e   : > { %712 = vmatpush.msk.msra.mxu2 %vm488_vm13, %v484_v50  ;;  %721 = vmatpush.msk.msra.mxu3 %vm489_vm14, %v485_v51  ;;  %vm519_vm13 = vcmask 588800  }
 0x1a3   : > { %v464_v53 = vpop.permute.xlu0 %463  ;;  %v425_v6 = vpop.permute.xlu2 %424 }
 0x1a4   : > { %v473_v54 = vpop.permute.xlu1 %472  ;;  %v467_v59 = vsel %vm465_vm1, %v464_v53, %v462_v52  ;;  %v466_v60 = vsel %vm465_vm1, %v462_v52, %v464_v53 }
 0x1a5   : > { %v475_v55 = vsel %vm474_vm15, %v471_v48, %v473_v54  ;;  %v476_v56 = vsel %vm474_vm15, %v473_v54, %v471_v48 }
 0x1a6   : > { %713 = vmatpush.msk.msra.mxu2 %vm1011_vm2, %v475_v55  ;;  %722 = vmatpush.msk.msra.mxu3 %vm1019_vm4, %v476_v56  ;;  %vm435_vm2 = vmand %vm1064_vm3, %vm1037_vm10 }
 0x1a7   : > { %vm436_vm4 = vmand %vm1070_vm5, %vm1045_vm11 }
 0x1a8   : > { %534 = vmatpush.msra.mxu2 %v983_v23  ;;  %554 = vmatpush.msra.mxu3 %v985_v24 }
 0x1aa   : > { %714 = vmatpush.msk.msra.mxu2 %vm1037_vm10, %v467_v59  ;;  %723 = vmatpush.msk.msra.mxu3 %vm1045_vm11, %v466_v60  ;;  %vm572_vm10 = vcmask 64512  }
 0x1ab   : > { %v440_v61 = vpop.permute.xlu0 %439  ;;  %v570_v20 = vpop.permute.xlu2 %569 }
 0x1ac   : > { %v449_v63 = vpop.permute.xlu1 %448 }
 0x1ad   : > { %v454_v0 = vsel %vm452_vm6, %v451_v62, %v449_v63  ;;  %v453_v1 = vsel %vm452_vm6, %v449_v63, %v451_v62 }
 0x1ae   : > { %715 = vmatpush.msk.msra.mxu2 %vm457_vm7, %v454_v0  ;;  %724 = vmatpush.msk.msra.mxu3 %vm458_vm8, %v453_v1 }
 0x1b3   : > { %v427_v2 = vpop.permute.xlu0 %426 }
 0x1b4   : > { %v442_v3 = vpop.permute.xlu1 %441  ;;  %v430_v8 = vsel %vm428_vm12, %v427_v2, %v425_v6  ;;  %v429_v10 = vsel %vm428_vm12, %v425_v6, %v427_v2 }
 0x1b5   : > { %v445_v4 = vsel %vm443_vm9, %v442_v3, %v440_v61  ;;  %v444_v5 = vsel %vm443_vm9, %v440_v61, %v442_v3 }
 0x1b6   : > { %716 = vmatpush.msk.msra.mxu2 %vm1064_vm3, %v445_v4  ;;  %725 = vmatpush.msk.msra.mxu3 %vm1070_vm5, %v444_v5 }
 0x1b8   : > { %717 = vmatpush.msk.msra.mxu2 %vm435_vm2, %v430_v8  ;;  %726 = vmatpush.msk.msra.mxu3 %vm436_vm4, %v429_v10 }
 0x1b9   : > { %718 = vmatmul.msk.f32.vlgmr.msra.gmra.mxu2 %vm519_vm13, %v512_v7  ;;  %727 = vmatmul.msk.f32.vlgmr.msra.gmra.mxu3 %vm519_vm13, %v512_v7 }
 0x1bc   : > { %v517_v12 = vpop.permute.xlu1 %516 }
 0x23c   : > { %v540_v13 = vpop.f32.mrf.mxu2  ;;  %v560_v14 = vpop.f32.mrf.mxu3 }
 0x23d   : > { %v541_v15 = vadd.f32 %v540_v13, %v517_v12  ;;  %v561_v16 = vadd.f32 %v560_v14, %v517_v12 }
 0x23f   : > { %v563_v17 = vmax.f32 %v541_v15, 0.0  ;;  %v564_v18 = vmax.f32 %v561_v16, 0.0 }
 0x241   : > { %591 = vmatpush.msrb.mxu0 %v563_v17  ;;  %611 = vmatpush.msrb.mxu1 %v564_v18 }
 0x242   : > { %729 = vmatmul.msk.f32.vlgmr.msrb.gmra.mxu1 %vm572_vm10, %v565_v19  ;;  %728 = vmatmul.msk.f32.vlgmr.msrb.gmra.mxu0 %vm572_vm10, %v565_v19 }
 0x2bf   : > { %v613_v21 = vpop.f32.mrf.mxu1  ;;  %v593_v22 = vpop.f32.mrf.mxu0 }
 0x2c0   : > { %v614_v23 = vadd.f32 %v613_v21, %v570_v20  ;;  %v594_v25 = vadd.f32 %v593_v22, %v570_v20 }
 0x2c2   : > { %v618_v24 = vrot.slane %v614_v23, 4 }
 0x2c4   : > { %v619_v26 = vsel %vm370_vm0, %v594_v25, %v618_v24 }
 0x2c5   : > { %v621_v27 = vadd.f32 %v619_v26, %v975_v9 }
 0x2c7   : > { %622 = vst [vmem:[%s325_s17] sm:$0xff] %v621_v27 }
 0x2c8   : > { %816 = shalt.err (!%p813_p3)
}
 0x2c9   : > { %737 = dma.vmem_to_hbm [thread:$0]  (%p951_p5), %s638_s21, 128, %s640_s22, %s624_s13  }
 0x2ca PF: > { %p743_p4 = scmp.ge.s32.totalorder %s851_s12, 2  ;;  %s651_s26 = sand.u32 1, %s839_s30  }
 0x2cb   : > { %s652_s16 = scalar_lea.sflag [#allocation3], %s651_s26 }
 0x2cc   : > { %p740_p7 = pnand %p743_p4, %p955_p6 }
 0x2ce   : > { %p741_p8 = pneg %p740_p7 }
 0x2d0   : > { %834 = dma.done.wait (%p741_p8), %s652_s16, 128  }
 0x2d1   : > { %836 = vsyncadd (%p741_p8), %s652_s16, 4294967168  ;;  %p19_p9 = scmp.ge.s32.totalorder %s938_s15, 4   ;;  %s1172_s30 = smov %s843_s10 }
 0x2d2   : > { %s1173_s10 = smov %s847_s11  ;;  %s1174_s11 = smov %s949_s18 }
 0x2d3   : > { %s1175_s12 = smov %s938_s15  ;;  %21 = sbr.rel (!%p19_p9) target bundleno = 3 (0x3), region = 91 }
 0x2d8   :  { %658 = vsyncpa [#allocation3], 1 }
 0x2d9   :  { %660 = vsyncpa [#allocation3 + $0x1], 1 }

</bundles_post_ra>
